<compile_context>
chip_gen: v7x
topology: tpu7x:2x2x1
jax: 0.10.0
libtpu: 0.0.40
codegen_flags: <defaults>
</compile_context>

<pallas_src>
import jax
import jax.numpy as jnp
from jax.experimental import pallas as pl
from jax.experimental.pallas import tpu as pltpu

MAX_BLOCK_ROWS = 512   # (512, 128) f32 = 256 KiB per input per grid step
ROW_QUANTUM = 16       # keeps block shapes legal for f32 / bf16 / f16 tilings
LOGIT_PAD = -1.0e4     # sigmoid(-1e4) == 0.0 exactly in f32


def _dice_partial_kernel(x_ref, t_ref, inter_ref, denom_ref):
    """Per-block partial sums for the dice loss.

    x_ref     : (block_rows, 128) logits tile (native float dtype)
    t_ref     : (block_rows, 128) target tile (native float dtype)
    inter_ref : (1, 8, 128) f32 partial sum of sigmoid(x) * t
    denom_ref : (1, 8, 128) f32 partial sum of sigmoid(x) + t
    """
    rows = x_ref.shape[0]
    # Chunk size: as large as possible while dividing the block row count.
    if rows % 64 == 0:
        chunk = 64
    elif rows % 32 == 0:
        chunk = 32
    else:
        chunk = 16
    k = rows // chunk

    def body(j, carry):
        inter_acc, denom_acc = carry
        r = pl.multiple_of(j * chunk, chunk)
        xs = x_ref[pl.ds(r, chunk), :].astype(jnp.float32)
        ts = t_ref[pl.ds(r, chunk), :].astype(jnp.float32)
        s = jax.nn.sigmoid(xs)
        return inter_acc + s * ts, denom_acc + (s + ts)

    zero = jnp.zeros((chunk, 128), jnp.float32)
    inter_acc, denom_acc = jax.lax.fori_loop(0, k, body, (zero, zero))

    # Fold the (chunk, 128) accumulators down to (8, 128) partial tiles
    # (sublane-aligned regroup + elementwise adds; no cross-lane reduction).
    inter_ref[0] = inter_acc.reshape(chunk // 8, 8, 128).sum(axis=0)
    denom_ref[0] = denom_acc.reshape(chunk // 8, 8, 128).sum(axis=0)


def _round_up(v, m):
    return -(-v // m) * m


@jax.jit
def dice_loss(logits, target):
    """Pallas implementation of DiceLoss.forward(input, target) -> scalar."""
    x = logits.reshape(-1)
    t = target.reshape(-1)
    # Keep native float dtypes for the DMA; only non-float inputs are cast.
    if not jnp.issubdtype(x.dtype, jnp.floating):
        x = x.astype(jnp.float32)
    if not jnp.issubdtype(t.dtype, jnp.floating):
        t = t.astype(jnp.float32)

    n = x.shape[0]
    rows = _round_up(_round_up(n, 128) // 128, ROW_QUANTUM)
    block_rows = min(MAX_BLOCK_ROWS, rows)
    total_rows = _round_up(rows, block_rows)
    num_blocks = total_rows // block_rows
    pad = total_rows * 128 - n

    # Pad so padded elements contribute exactly 0 to every sum:
    # sigmoid(LOGIT_PAD) == 0.0 and target pad == 0.0  -> no in-kernel mask.
    x2d = jnp.pad(x, (0, pad), constant_values=LOGIT_PAD).reshape(total_rows, 128)
    t2d = jnp.pad(t, (0, pad)).reshape(total_rows, 128)

    inter_p, denom_p = pl.pallas_call(
        _dice_partial_kernel,
        grid=(num_blocks,),
        in_specs=[
            pl.BlockSpec((block_rows, 128), lambda i: (i, 0)),
            pl.BlockSpec((block_rows, 128), lambda i: (i, 0)),
        ],
        out_specs=[
            pl.BlockSpec((1, 8, 128), lambda i: (i, 0, 0)),
            pl.BlockSpec((1, 8, 128), lambda i: (i, 0, 0)),
        ],
        out_shape=[
            jax.ShapeDtypeStruct((num_blocks, 8, 128), jnp.float32),
            jax.ShapeDtypeStruct((num_blocks, 8, 128), jnp.float32),
        ],
        compiler_params=pltpu.CompilerParams(
            dimension_semantics=("parallel",)),
    )(x2d, t2d)

    # Tiny epilogue: reduce the per-block partial tiles and apply the formula.
    smooth = jnp.float32(1.0)
    intersection = jnp.sum(inter_p)
    denominator = jnp.sum(denom_p)
    return 1.0 - (2.0 * intersection + smooth) / (denominator + smooth)


if __name__ == "__main__":
    key = jax.random.PRNGKey(0)
    k1, k2 = jax.random.split(key)

    # Small segmentation-style NCHW inputs.
    logits = jax.random.normal(k1, (2, 4, 16, 16), dtype=jnp.float32)
    target = (jax.random.uniform(k2, (2, 4, 16, 16)) > 0.5).astype(jnp.float32)

    loss = dice_loss(logits, target)
    jax.block_until_ready(loss)

    # Pure-JAX reference of the exact PyTorch semantics.
    s = jax.nn.sigmoid(logits).reshape(-1)
    tt = target.reshape(-1)
    ref = 1.0 - (2.0 * jnp.sum(s * tt) + 1.0) / (jnp.sum(s) + jnp.sum(tt) + 1.0)
    assert jnp.allclose(loss, ref, atol=1e-5, rtol=1e-5), (loss, ref)

    print("KERNEL_OK")
</pallas_src>

<mosaic_0001>
module attributes {stable_mosaic.version = 11 : i64} {
  func.func @_dice_partial_kernel(%arg0: i32, %arg1: memref<16x128xf32, #tpu.memory_space<vmem>>, %arg2: memref<16x128xf32, #tpu.memory_space<vmem>>, %arg3: memref<1x8x128xf32, #tpu.memory_space<vmem>>, %arg4: memref<1x8x128xf32, #tpu.memory_space<vmem>>) attributes {dimension_semantics = [#tpu.dimension_semantics<parallel>], iteration_bounds = array<i64: 1>, scalar_prefetch = 0 : i64, scratch_operands = 0 : i64, tpu.core_type = #tpu.core_type<tc>, window_params = [{transform_indices = @transform_0, window_bounds = array<i64: 16, 128>}, {transform_indices = @transform_1, window_bounds = array<i64: 16, 128>}, {transform_indices = @transform_2, window_bounds = array<i64: 1, 8, 128>}, {transform_indices = @transform_3, window_bounds = array<i64: 1, 8, 128>}]} {
    %cst = arith.constant 0.000000e+00 : f32
    %0 = vector.broadcast %cst : f32 to vector<16x128xf32>
    %c0_i32 = arith.constant 0 : i32
    %c16_i32 = arith.constant 16 : i32
    %1 = arith.muli %c0_i32, %c16_i32 : i32
    %2 = tpu.assume_multiple %1, 16 : i32
    %3 = arith.index_cast %2 : i32 to index
    %c0 = arith.constant 0 : index
    %4 = vector.load %arg1[%3, %c0] : memref<16x128xf32, #tpu.memory_space<vmem>>, vector<16x128xf32>
    %5 = arith.index_cast %2 : i32 to index
    %c0_0 = arith.constant 0 : index
    %6 = vector.load %arg2[%5, %c0_0] : memref<16x128xf32, #tpu.memory_space<vmem>>, vector<16x128xf32>
    %7 = arith.negf %4 : vector<16x128xf32>
    %8 = math.exp %7 : vector<16x128xf32>
    %cst_1 = arith.constant 1.000000e+00 : f32
    %9 = vector.broadcast %cst_1 : f32 to vector<16x128xf32>
    %10 = arith.addf %9, %8 : vector<16x128xf32>
    %11 = arith.divf %9, %10 : vector<16x128xf32>
    %12 = arith.mulf %11, %6 : vector<16x128xf32>
    %13 = arith.addf %0, %12 : vector<16x128xf32>
    %14 = arith.addf %11, %6 : vector<16x128xf32>
    %15 = arith.addf %0, %14 : vector<16x128xf32>
    %c1_i32 = arith.constant 1 : i32
    %16 = vector.shape_cast %13 : vector<16x128xf32> to vector<2x8x128xf32>
    %cst_2 = arith.constant dense<0.000000e+00> : vector<8x128xf32>
    %17 = vector.multi_reduction <add>, %16, %cst_2 [0] : vector<2x8x128xf32> to vector<8x128xf32>
    %c0_3 = arith.constant 0 : index
    %c0_4 = arith.constant 0 : index
    %c0_5 = arith.constant 0 : index
    %18 = vector.load %arg3[%c0_3, %c0_4, %c0_5] : memref<1x8x128xf32, #tpu.memory_space<vmem>>, vector<1x8x128xf32>
    %19 = vector.shape_cast %18 : vector<1x8x128xf32> to vector<8x128xf32>
    %20 = vector.shape_cast %17 : vector<8x128xf32> to vector<1x8x128xf32>
    tpu.vector_store %arg3[%c0_3, %c0_4, %c0_5], %20 {strides = array<i32>} : memref<1x8x128xf32, #tpu.memory_space<vmem>>, vector<1x8x128xf32>,
    %21 = vector.shape_cast %15 : vector<16x128xf32> to vector<2x8x128xf32>
    %cst_6 = arith.constant dense<0.000000e+00> : vector<8x128xf32>
    %22 = vector.multi_reduction <add>, %21, %cst_6 [0] : vector<2x8x128xf32> to vector<8x128xf32>
    %c0_7 = arith.constant 0 : index
    %c0_8 = arith.constant 0 : index
    %c0_9 = arith.constant 0 : index
    %23 = vector.load %arg4[%c0_7, %c0_8, %c0_9] : memref<1x8x128xf32, #tpu.memory_space<vmem>>, vector<1x8x128xf32>
    %24 = vector.shape_cast %23 : vector<1x8x128xf32> to vector<8x128xf32>
    %25 = vector.shape_cast %22 : vector<8x128xf32> to vector<1x8x128xf32>
    tpu.vector_store %arg4[%c0_7, %c0_8, %c0_9], %25 {strides = array<i32>} : memref<1x8x128xf32, #tpu.memory_space<vmem>>, vector<1x8x128xf32>,
    return
  }
  func.func @transform_0(%arg0: i32) -> (i32, i32) {
    %c0_i32 = arith.constant 0 : i32
    %c0_i32_0 = arith.constant 0 : i32
    return %arg0, %c0_i32 : i32, i32
  }
  func.func @transform_1(%arg0: i32) -> (i32, i32) {
    %c0_i32 = arith.constant 0 : i32
    %c0_i32_0 = arith.constant 0 : i32
    return %arg0, %c0_i32 : i32, i32
  }
  func.func @transform_2(%arg0: i32) -> (i32, i32, i32) {
    %c0_i32 = arith.constant 0 : i32
    %c0_i32_0 = arith.constant 0 : i32
    %c0_i32_1 = arith.constant 0 : i32
    return %arg0, %c0_i32, %c0_i32_0 : i32, i32, i32
  }
  func.func @transform_3(%arg0: i32) -> (i32, i32, i32) {
    %c0_i32 = arith.constant 0 : i32
    %c0_i32_0 = arith.constant 0 : i32
    %c0_i32_1 = arith.constant 0 : i32
    return %arg0, %c0_i32, %c0_i32_0 : i32, i32, i32
  }
}

</mosaic_0001>

<bundles_post_ra>
// kernel: dice_loss.1
= control target key start
LH: loop header
LB: loop body
LE: loop exit
PB: predicated region body
PF: predicated region fallthrough
CT: control target
= control target key end

     0   :  { %s97_s0 = inlined_call_operand.vmem [shape: f32[16,128], index: 0, kind: input, shape index: {}]   ;;  %s98_s1 = inlined_call_operand.vmem [shape: f32[16,128], index: 1, kind: input, shape index: {}]   ;;  %s99_s2 = inlined_call_operand.vmem [shape: f32[1,8,128], index: 2, kind: output, shape index: {0}]   ;;  %s100_s3 = inlined_call_operand.vmem [shape: f32[1,8,128], index: 3, kind: output, shape index: {1}]  }
   0x1   :  { %v13_v0 = vld [vmem:[%s97_s0] sm:$0xff]  ;;  %v14_v1 = vld [vmem:[%s97_s0 + $0x8] sm:$0xff] }
   0x2   :  { %v49_v2 = vmul.f32 -1.442695, %v13_v0  ;;  %v50_v3 = vmul.f32 -1.442695, %v14_v1  ;;  %v15_v8 = vld [vmem:[%s98_s1] sm:$0xff]  ;;  %v16_v9 = vld [vmem:[%s98_s1 + $0x8] sm:$0xff] }
   0x4   :  { %51 = vpow2.f32 %v49_v2 }
   0x5   :  { %53 = vpow2.f32 %v50_v3 }
   0xe   :  { %v52_v4 = vpop.eup %51 }
   0xf   :  { %v54_v5 = vpop.eup %53  ;;  %v23_v6 = vadd.f32 1.0, %v52_v4 }
  0x10   :  { %v24_v7 = vadd.f32 1.0, %v54_v5 }
  0x11   :  { %55 = vrcp.f32 %v23_v6 }
  0x12   :  { %57 = vrcp.f32 %v24_v7 }
  0x1b   :  { %v56_v10 = vpop.eup %55 }
  0x1c   :  { %v58_v11 = vpop.eup %57  ;;  %v29_v12 = vmul.f32 %v56_v10, %v15_v8  ;;  %v33_v13 = vadd.f32 %v56_v10, %v15_v8 }
  0x1d   :  { %v30_v14 = vmul.f32 %v58_v11, %v16_v9  ;;  %v34_v15 = vadd.f32 %v58_v11, %v16_v9 }
  0x1f   :  { %v37_v16 = vadd.f32 %v30_v14, %v29_v12  ;;  %v39_v17 = vadd.f32 %v34_v15, %v33_v13 }
  0x21   :  { %38 = vst [vmem:[%s99_s2] sm:$0xff] %v37_v16  ;;  %40 = vst [vmem:[%s100_s3] sm:$0xff] %v39_v17 }

</bundles_post_ra>
